<compile_context>
chip_gen: v5e
topology: v5e:2x2
jax: 0.10.0
libtpu: 0.0.40
codegen_flags: <defaults>
</compile_context>

<pallas_src>
import jax
import jax.numpy as jnp
from jax.experimental import pallas as pl
from jax.experimental.pallas import tpu as pltpu


# ----------------------------- Pallas kernel -------------------------------

def split_fg_kernel(p_ref, x_ref, o_ref):
    """Fused 3x [1x1-conv(BN folded) + bias + ReLU].

    p_ref: (P,) f32 in SMEM — packed [w1, b1, w2, b2, w3, b3]
    x_ref: (C_in,  rows, 128) input pixel tile (channel planes)
    o_ref: (C_out, rows, 128) output pixel tile
    """
    c_in = x_ref.shape[0]
    c_half = o_ref.shape[0]

    # Static offsets into the packed parameter vector.
    w1 = 0
    b1 = w1 + c_half * c_in
    w2 = b1 + c_half
    b2 = w2 + c_half * c_half
    w3 = b2 + c_half
    b3 = w3 + c_half * c_half

    def mix(planes, w_off, b_off, n_in, n_out):
        """One conv1x1+bias+ReLU stage on dense (rows,128) channel planes."""
        outs = []
        for c in range(n_out):
            acc = p_ref[w_off + c * n_in] * planes[0]
            for i in range(1, n_in):
                acc = acc + p_ref[w_off + c * n_in + i] * planes[i]
            outs.append(jnp.maximum(acc + p_ref[b_off + c], 0.0))
        return outs

    x_planes = [x_ref[i].astype(jnp.float32) for i in range(c_in)]
    h = mix(x_planes, w1, b1, c_in, c_half)
    h = mix(h, w2, b2, c_half, c_half)
    h = mix(h, w3, b3, c_half, c_half)
    for c in range(c_half):
        o_ref[c] = h[c].astype(o_ref.dtype)


# ------------------------------- wrapper ------------------------------------

def _round_up(a, b):
    return ((a + b - 1) // b) * b


def split_fg_pallas(x_nchw, params, *, tile_hw=32768):
    """Fused Split_fg forward.

    x_nchw: (N, C_in, H, W)
    params: dict with w1..w3 (C_out, C_in) BN-scale-folded conv weights and
            b1..b3 (C_out,) folded BN biases.
    tile_hw: pixel-tile size in lanes (multiple of 128; default 32K lanes).
    """
    N, C_in, H, W = x_nchw.shape
    C_half = params["w1"].shape[0]
    HW = H * W

    # Pack all (tiny) weights/biases into one flat f32 vector -> SMEM operand.
    packed = jnp.concatenate([
        params["w1"].reshape(-1), params["b1"].reshape(-1),
        params["w2"].reshape(-1), params["b2"].reshape(-1),
        params["w3"].reshape(-1), params["b3"].reshape(-1),
    ]).astype(jnp.float32)

    # Lane-dense layout: pixels as (rows, 128) so each channel is a dense slab.
    # Pad only to a multiple of 128 (no-op in the common aligned case).
    HW_pad = _round_up(HW, 128)
    x3d = x_nchw.reshape(N, C_in, HW)
    if HW_pad != HW:
        x3d = jnp.pad(x3d, ((0, 0), (0, 0), (0, HW_pad - HW)))
    rows_total = HW_pad // 128
    x4d = x3d.reshape(N, C_in, rows_total, 128)

    # Pixel-tile selection: big tiles amortize per-step overhead while staying
    # a few MiB of double-buffered VMEM (fits v7x's smaller budget).
    desired_rows = max(1, tile_hw // 128)
    if rows_total <= desired_rows:
        tile_rows = rows_total                      # block == full dim (allowed)
    else:
        tile_rows = max(8, (desired_rows // 8) * 8)  # multiple of 8 sublanes
    # v7x megacore: keep at least 2 parallel grid steps so both TCs get work.
    if N * pl.cdiv(rows_total, tile_rows) < 2 and rows_total >= 16:
        tile_rows = max(8, ((rows_total // 2) // 8) * 8)

    grid = (N, pl.cdiv(rows_total, tile_rows))

    def tile_map(n, j):
        return (n, 0, j, 0)

    out4d = pl.pallas_call(
        split_fg_kernel,
        out_shape=jax.ShapeDtypeStruct((N, C_half, rows_total, 128),
                                       x_nchw.dtype),
        grid_spec=pl.GridSpec(
            grid=grid,
            in_specs=[
                # packed weights/biases: whole array in SMEM, scalar reads
                pl.BlockSpec(memory_space=pltpu.MemorySpace.SMEM),
                # input pixel tile (N squeezed)
                pl.BlockSpec((None, C_in, tile_rows, 128), tile_map),
            ],
            out_specs=pl.BlockSpec((None, C_half, tile_rows, 128), tile_map),
        ),
        compiler_params=pltpu.CompilerParams(
            dimension_semantics=("parallel", "parallel"),
            vmem_limit_bytes=32 * 1024 * 1024,
        ),
    )(packed, x4d)

    out3d = out4d.reshape(N, C_half, HW_pad)
    if HW_pad != HW:
        out3d = out3d[:, :, :HW]
    return out3d.reshape(N, C_half, H, W)


# --------------------------- parameter construction ------------------------

def make_params(key, out_channel):
    """Deterministic synthetic parameters matching Split_fg's __init__ shapes.

    PyTorch conv weights are (C_out, C_in, 1, 1); we keep the (C_out, C_in)
    form.  Eval-mode BatchNorm is folded:
      scale = gamma / sqrt(var + eps),  bias = beta - mean * scale
      w'    = scale[:, None] * w        (scale folded into the conv weight)
    """
    C_half = out_channel // 2
    eps = 1e-5
    keys = jax.random.split(key, 12)
    params = {}
    c_ins = [out_channel, C_half, C_half]
    for i in range(3):
        c_in = c_ins[i]
        w = jax.random.normal(keys[4 * i + 0], (C_half, c_in),
                              dtype=jnp.float32) * 0.2
        gamma = 1.0 + 0.1 * jax.random.normal(keys[4 * i + 1], (C_half,),
                                              dtype=jnp.float32)
        beta = 0.1 * jax.random.normal(keys[4 * i + 2], (C_half,),
                                       dtype=jnp.float32)
        rmean = 0.1 * jax.random.normal(keys[4 * i + 3], (C_half,),
                                        dtype=jnp.float32)
        rvar = jnp.abs(rmean) + 0.5  # positive, deterministic
        scale = gamma / jnp.sqrt(rvar + eps)
        bias = beta - rmean * scale
        params[f"w{i + 1}"] = w * scale[:, None]          # BN scale folded
        params[f"b{i + 1}"] = bias                        # (C_half,)
    return params


def reference_forward(x_nchw, params):
    """Pure-JAX reference for correctness checking."""
    N, C, H, W = x_nchw.shape
    h = x_nchw.reshape(N, C, H * W).astype(jnp.float32)
    for i in (1, 2, 3):
        w = params[f"w{i}"]              # (C_out, C_in)
        b = params[f"b{i}"]              # (C_out,)
        h = jnp.einsum("oi,nil->nol", w, h) + b[None, :, None]
        h = jnp.maximum(h, 0.0)
    C_half = params["w1"].shape[0]
    return h.reshape(N, C_half, H, W).astype(x_nchw.dtype)


# --------------------------------- main -------------------------------------

if __name__ == "__main__":
    out_channel = 8          # module's global `out_channel` (kept small)
    N, H, W = 2, 16, 16

    key = jax.random.PRNGKey(0)
    k_x, k_p = jax.random.split(key)
    x = jax.random.normal(k_x, (N, out_channel, H, W), dtype=jnp.float32)
    params = make_params(k_p, out_channel)

    out = split_fg_pallas(x, params)
    out = jax.block_until_ready(out)

    ref = reference_forward(x, params)
    assert out.shape == (N, out_channel // 2, H, W)
    assert jnp.allclose(out, ref, atol=1e-4, rtol=1e-4)

    print("KERNEL_OK")
</pallas_src>

<mosaic_0001>
module attributes {stable_mosaic.version = 11 : i64} {
  func.func @split_fg_kernel(%arg0: i32, %arg1: i32, %arg2: memref<76xf32, #tpu.memory_space<smem>>, %arg3: memref<1x8x2x128xf32, #tpu.memory_space<vmem>>, %arg4: memref<1x4x2x128xf32, #tpu.memory_space<vmem>>) attributes {dimension_semantics = [#tpu.dimension_semantics<parallel>, #tpu.dimension_semantics<parallel>], iteration_bounds = array<i64: 2, 1>, scalar_prefetch = 0 : i64, scratch_operands = 0 : i64, tpu.core_type = #tpu.core_type<tc>, window_params = [{transform_indices = @transform_0, window_bounds = array<i64: 76>}, {transform_indices = @transform_1, window_bounds = array<i64: 1, 8, 2, 128>}, {transform_indices = @transform_2, window_bounds = array<i64: 1, 4, 2, 128>}]} {
    %c0 = arith.constant 0 : index
    %c0_0 = arith.constant 0 : index
    %c0_1 = arith.constant 0 : index
    %c0_2 = arith.constant 0 : index
    %0 = vector.load %arg3[%c0, %c0_0, %c0_1, %c0_2] : memref<1x8x2x128xf32, #tpu.memory_space<vmem>>, vector<1x1x2x128xf32>
    %1 = vector.shape_cast %0 : vector<1x1x2x128xf32> to vector<2x128xf32>
    %c0_3 = arith.constant 0 : index
    %c1 = arith.constant 1 : index
    %c0_4 = arith.constant 0 : index
    %c0_5 = arith.constant 0 : index
    %2 = vector.load %arg3[%c0_3, %c1, %c0_4, %c0_5] : memref<1x8x2x128xf32, #tpu.memory_space<vmem>>, vector<1x1x2x128xf32>
    %3 = vector.shape_cast %2 : vector<1x1x2x128xf32> to vector<2x128xf32>
    %c0_6 = arith.constant 0 : index
    %c2 = arith.constant 2 : index
    %c0_7 = arith.constant 0 : index
    %c0_8 = arith.constant 0 : index
    %4 = vector.load %arg3[%c0_6, %c2, %c0_7, %c0_8] : memref<1x8x2x128xf32, #tpu.memory_space<vmem>>, vector<1x1x2x128xf32>
    %5 = vector.shape_cast %4 : vector<1x1x2x128xf32> to vector<2x128xf32>
    %c0_9 = arith.constant 0 : index
    %c3 = arith.constant 3 : index
    %c0_10 = arith.constant 0 : index
    %c0_11 = arith.constant 0 : index
    %6 = vector.load %arg3[%c0_9, %c3, %c0_10, %c0_11] : memref<1x8x2x128xf32, #tpu.memory_space<vmem>>, vector<1x1x2x128xf32>
    %7 = vector.shape_cast %6 : vector<1x1x2x128xf32> to vector<2x128xf32>
    %c0_12 = arith.constant 0 : index
    %c4 = arith.constant 4 : index
    %c0_13 = arith.constant 0 : index
    %c0_14 = arith.constant 0 : index
    %8 = vector.load %arg3[%c0_12, %c4, %c0_13, %c0_14] : memref<1x8x2x128xf32, #tpu.memory_space<vmem>>, vector<1x1x2x128xf32>
    %9 = vector.shape_cast %8 : vector<1x1x2x128xf32> to vector<2x128xf32>
    %c0_15 = arith.constant 0 : index
    %c5 = arith.constant 5 : index
    %c0_16 = arith.constant 0 : index
    %c0_17 = arith.constant 0 : index
    %10 = vector.load %arg3[%c0_15, %c5, %c0_16, %c0_17] : memref<1x8x2x128xf32, #tpu.memory_space<vmem>>, vector<1x1x2x128xf32>
    %11 = vector.shape_cast %10 : vector<1x1x2x128xf32> to vector<2x128xf32>
    %c0_18 = arith.constant 0 : index
    %c6 = arith.constant 6 : index
    %c0_19 = arith.constant 0 : index
    %c0_20 = arith.constant 0 : index
    %12 = vector.load %arg3[%c0_18, %c6, %c0_19, %c0_20] : memref<1x8x2x128xf32, #tpu.memory_space<vmem>>, vector<1x1x2x128xf32>
    %13 = vector.shape_cast %12 : vector<1x1x2x128xf32> to vector<2x128xf32>
    %c0_21 = arith.constant 0 : index
    %c7 = arith.constant 7 : index
    %c0_22 = arith.constant 0 : index
    %c0_23 = arith.constant 0 : index
    %14 = vector.load %arg3[%c0_21, %c7, %c0_22, %c0_23] : memref<1x8x2x128xf32, #tpu.memory_space<vmem>>, vector<1x1x2x128xf32>
    %15 = vector.shape_cast %14 : vector<1x1x2x128xf32> to vector<2x128xf32>
    %c0_24 = arith.constant 0 : index
    %16 = memref.load %arg2[%c0_24] : memref<76xf32, #tpu.memory_space<smem>>
    %17 = vector.broadcast %16 : f32 to vector<2x128xf32>
    %18 = arith.mulf %17, %1 : vector<2x128xf32>
    %c1_25 = arith.constant 1 : index
    %19 = memref.load %arg2[%c1_25] : memref<76xf32, #tpu.memory_space<smem>>
    %20 = vector.broadcast %19 : f32 to vector<2x128xf32>
    %21 = arith.mulf %20, %3 : vector<2x128xf32>
    %22 = arith.addf %18, %21 : vector<2x128xf32>
    %c2_26 = arith.constant 2 : index
    %23 = memref.load %arg2[%c2_26] : memref<76xf32, #tpu.memory_space<smem>>
    %24 = vector.broadcast %23 : f32 to vector<2x128xf32>
    %25 = arith.mulf %24, %5 : vector<2x128xf32>
    %26 = arith.addf %22, %25 : vector<2x128xf32>
    %c3_27 = arith.constant 3 : index
    %27 = memref.load %arg2[%c3_27] : memref<76xf32, #tpu.memory_space<smem>>
    %28 = vector.broadcast %27 : f32 to vector<2x128xf32>
    %29 = arith.mulf %28, %7 : vector<2x128xf32>
    %30 = arith.addf %26, %29 : vector<2x128xf32>
    %c4_28 = arith.constant 4 : index
    %31 = memref.load %arg2[%c4_28] : memref<76xf32, #tpu.memory_space<smem>>
    %32 = vector.broadcast %31 : f32 to vector<2x128xf32>
    %33 = arith.mulf %32, %9 : vector<2x128xf32>
    %34 = arith.addf %30, %33 : vector<2x128xf32>
    %c5_29 = arith.constant 5 : index
    %35 = memref.load %arg2[%c5_29] : memref<76xf32, #tpu.memory_space<smem>>
    %36 = vector.broadcast %35 : f32 to vector<2x128xf32>
    %37 = arith.mulf %36, %11 : vector<2x128xf32>
    %38 = arith.addf %34, %37 : vector<2x128xf32>
    %c6_30 = arith.constant 6 : index
    %39 = memref.load %arg2[%c6_30] : memref<76xf32, #tpu.memory_space<smem>>
    %40 = vector.broadcast %39 : f32 to vector<2x128xf32>
    %41 = arith.mulf %40, %13 : vector<2x128xf32>
    %42 = arith.addf %38, %41 : vector<2x128xf32>
    %c7_31 = arith.constant 7 : index
    %43 = memref.load %arg2[%c7_31] : memref<76xf32, #tpu.memory_space<smem>>
    %44 = vector.broadcast %43 : f32 to vector<2x128xf32>
    %45 = arith.mulf %44, %15 : vector<2x128xf32>
    %46 = arith.addf %42, %45 : vector<2x128xf32>
    %c32 = arith.constant 32 : index
    %47 = memref.load %arg2[%c32] : memref<76xf32, #tpu.memory_space<smem>>
    %48 = vector.broadcast %47 : f32 to vector<2x128xf32>
    %49 = arith.addf %46, %48 : vector<2x128xf32>
    %cst = arith.constant 0.000000e+00 : f32
    %50 = vector.broadcast %cst : f32 to vector<2x128xf32>
    %51 = arith.maximumf %49, %50 : vector<2x128xf32>
    %c8 = arith.constant 8 : index
    %52 = memref.load %arg2[%c8] : memref<76xf32, #tpu.memory_space<smem>>
    %53 = vector.broadcast %52 : f32 to vector<2x128xf32>
    %54 = arith.mulf %53, %1 : vector<2x128xf32>
    %c9 = arith.constant 9 : index
    %55 = memref.load %arg2[%c9] : memref<76xf32, #tpu.memory_space<smem>>
    %56 = vector.broadcast %55 : f32 to vector<2x128xf32>
    %57 = arith.mulf %56, %3 : vector<2x128xf32>
    %58 = arith.addf %54, %57 : vector<2x128xf32>
    %c10 = arith.constant 10 : index
    %59 = memref.load %arg2[%c10] : memref<76xf32, #tpu.memory_space<smem>>
    %60 = vector.broadcast %59 : f32 to vector<2x128xf32>
    %61 = arith.mulf %60, %5 : vector<2x128xf32>
    %62 = arith.addf %58, %61 : vector<2x128xf32>
    %c11 = arith.constant 11 : index
    %63 = memref.load %arg2[%c11] : memref<76xf32, #tpu.memory_space<smem>>
    %64 = vector.broadcast %63 : f32 to vector<2x128xf32>
    %65 = arith.mulf %64, %7 : vector<2x128xf32>
    %66 = arith.addf %62, %65 : vector<2x128xf32>
    %c12 = arith.constant 12 : index
    %67 = memref.load %arg2[%c12] : memref<76xf32, #tpu.memory_space<smem>>
    %68 = vector.broadcast %67 : f32 to vector<2x128xf32>
    %69 = arith.mulf %68, %9 : vector<2x128xf32>
    %70 = arith.addf %66, %69 : vector<2x128xf32>
    %c13 = arith.constant 13 : index
    %71 = memref.load %arg2[%c13] : memref<76xf32, #tpu.memory_space<smem>>
    %72 = vector.broadcast %71 : f32 to vector<2x128xf32>
    %73 = arith.mulf %72, %11 : vector<2x128xf32>
    %74 = arith.addf %70, %73 : vector<2x128xf32>
    %c14 = arith.constant 14 : index
    %75 = memref.load %arg2[%c14] : memref<76xf32, #tpu.memory_space<smem>>
    %76 = vector.broadcast %75 : f32 to vector<2x128xf32>
    %77 = arith.mulf %76, %13 : vector<2x128xf32>
    %78 = arith.addf %74, %77 : vector<2x128xf32>
    %c15 = arith.constant 15 : index
    %79 = memref.load %arg2[%c15] : memref<76xf32, #tpu.memory_space<smem>>
    %80 = vector.broadcast %79 : f32 to vector<2x128xf32>
    %81 = arith.mulf %80, %15 : vector<2x128xf32>
    %82 = arith.addf %78, %81 : vector<2x128xf32>
    %c33 = arith.constant 33 : index
    %83 = memref.load %arg2[%c33] : memref<76xf32, #tpu.memory_space<smem>>
    %84 = vector.broadcast %83 : f32 to vector<2x128xf32>
    %85 = arith.addf %82, %84 : vector<2x128xf32>
    %cst_32 = arith.constant 0.000000e+00 : f32
    %86 = vector.broadcast %cst_32 : f32 to vector<2x128xf32>
    %87 = arith.maximumf %85, %86 : vector<2x128xf32>
    %c16 = arith.constant 16 : index
    %88 = memref.load %arg2[%c16] : memref<76xf32, #tpu.memory_space<smem>>
    %89 = vector.broadcast %88 : f32 to vector<2x128xf32>
    %90 = arith.mulf %89, %1 : vector<2x128xf32>
    %c17 = arith.constant 17 : index
    %91 = memref.load %arg2[%c17] : memref<76xf32, #tpu.memory_space<smem>>
    %92 = vector.broadcast %91 : f32 to vector<2x128xf32>
    %93 = arith.mulf %92, %3 : vector<2x128xf32>
    %94 = arith.addf %90, %93 : vector<2x128xf32>
    %c18 = arith.constant 18 : index
    %95 = memref.load %arg2[%c18] : memref<76xf32, #tpu.memory_space<smem>>
    %96 = vector.broadcast %95 : f32 to vector<2x128xf32>
    %97 = arith.mulf %96, %5 : vector<2x128xf32>
    %98 = arith.addf %94, %97 : vector<2x128xf32>
    %c19 = arith.constant 19 : index
    %99 = memref.load %arg2[%c19] : memref<76xf32, #tpu.memory_space<smem>>
    %100 = vector.broadcast %99 : f32 to vector<2x128xf32>
    %101 = arith.mulf %100, %7 : vector<2x128xf32>
    %102 = arith.addf %98, %101 : vector<2x128xf32>
    %c20 = arith.constant 20 : index
    %103 = memref.load %arg2[%c20] : memref<76xf32, #tpu.memory_space<smem>>
    %104 = vector.broadcast %103 : f32 to vector<2x128xf32>
    %105 = arith.mulf %104, %9 : vector<2x128xf32>
    %106 = arith.addf %102, %105 : vector<2x128xf32>
    %c21 = arith.constant 21 : index
    %107 = memref.load %arg2[%c21] : memref<76xf32, #tpu.memory_space<smem>>
    %108 = vector.broadcast %107 : f32 to vector<2x128xf32>
    %109 = arith.mulf %108, %11 : vector<2x128xf32>
    %110 = arith.addf %106, %109 : vector<2x128xf32>
    %c22 = arith.constant 22 : index
    %111 = memref.load %arg2[%c22] : memref<76xf32, #tpu.memory_space<smem>>
    %112 = vector.broadcast %111 : f32 to vector<2x128xf32>
    %113 = arith.mulf %112, %13 : vector<2x128xf32>
    %114 = arith.addf %110, %113 : vector<2x128xf32>
    %c23 = arith.constant 23 : index
    %115 = memref.load %arg2[%c23] : memref<76xf32, #tpu.memory_space<smem>>
    %116 = vector.broadcast %115 : f32 to vector<2x128xf32>
    %117 = arith.mulf %116, %15 : vector<2x128xf32>
    %118 = arith.addf %114, %117 : vector<2x128xf32>
    %c34 = arith.constant 34 : index
    %119 = memref.load %arg2[%c34] : memref<76xf32, #tpu.memory_space<smem>>
    %120 = vector.broadcast %119 : f32 to vector<2x128xf32>
    %121 = arith.addf %118, %120 : vector<2x128xf32>
    %cst_33 = arith.constant 0.000000e+00 : f32
    %122 = vector.broadcast %cst_33 : f32 to vector<2x128xf32>
    %123 = arith.maximumf %121, %122 : vector<2x128xf32>
    %c24 = arith.constant 24 : index
    %124 = memref.load %arg2[%c24] : memref<76xf32, #tpu.memory_space<smem>>
    %125 = vector.broadcast %124 : f32 to vector<2x128xf32>
    %126 = arith.mulf %125, %1 : vector<2x128xf32>
    %c25 = arith.constant 25 : index
    %127 = memref.load %arg2[%c25] : memref<76xf32, #tpu.memory_space<smem>>
    %128 = vector.broadcast %127 : f32 to vector<2x128xf32>
    %129 = arith.mulf %128, %3 : vector<2x128xf32>
    %130 = arith.addf %126, %129 : vector<2x128xf32>
    %c26 = arith.constant 26 : index
    %131 = memref.load %arg2[%c26] : memref<76xf32, #tpu.memory_space<smem>>
    %132 = vector.broadcast %131 : f32 to vector<2x128xf32>
    %133 = arith.mulf %132, %5 : vector<2x128xf32>
    %134 = arith.addf %130, %133 : vector<2x128xf32>
    %c27 = arith.constant 27 : index
    %135 = memref.load %arg2[%c27] : memref<76xf32, #tpu.memory_space<smem>>
    %136 = vector.broadcast %135 : f32 to vector<2x128xf32>
    %137 = arith.mulf %136, %7 : vector<2x128xf32>
    %138 = arith.addf %134, %137 : vector<2x128xf32>
    %c28 = arith.constant 28 : index
    %139 = memref.load %arg2[%c28] : memref<76xf32, #tpu.memory_space<smem>>
    %140 = vector.broadcast %139 : f32 to vector<2x128xf32>
    %141 = arith.mulf %140, %9 : vector<2x128xf32>
    %142 = arith.addf %138, %141 : vector<2x128xf32>
    %c29 = arith.constant 29 : index
    %143 = memref.load %arg2[%c29] : memref<76xf32, #tpu.memory_space<smem>>
    %144 = vector.broadcast %143 : f32 to vector<2x128xf32>
    %145 = arith.mulf %144, %11 : vector<2x128xf32>
    %146 = arith.addf %142, %145 : vector<2x128xf32>
    %c30 = arith.constant 30 : index
    %147 = memref.load %arg2[%c30] : memref<76xf32, #tpu.memory_space<smem>>
    %148 = vector.broadcast %147 : f32 to vector<2x128xf32>
    %149 = arith.mulf %148, %13 : vector<2x128xf32>
    %150 = arith.addf %146, %149 : vector<2x128xf32>
    %c31 = arith.constant 31 : index
    %151 = memref.load %arg2[%c31] : memref<76xf32, #tpu.memory_space<smem>>
    %152 = vector.broadcast %151 : f32 to vector<2x128xf32>
    %153 = arith.mulf %152, %15 : vector<2x128xf32>
    %154 = arith.addf %150, %153 : vector<2x128xf32>
    %c35 = arith.constant 35 : index
    %155 = memref.load %arg2[%c35] : memref<76xf32, #tpu.memory_space<smem>>
    %156 = vector.broadcast %155 : f32 to vector<2x128xf32>
    %157 = arith.addf %154, %156 : vector<2x128xf32>
    %cst_34 = arith.constant 0.000000e+00 : f32
    %158 = vector.broadcast %cst_34 : f32 to vector<2x128xf32>
    %159 = arith.maximumf %157, %158 : vector<2x128xf32>
    %c36 = arith.constant 36 : index
    %160 = memref.load %arg2[%c36] : memref<76xf32, #tpu.memory_space<smem>>
    %161 = vector.broadcast %160 : f32 to vector<2x128xf32>
    %162 = arith.mulf %161, %51 : vector<2x128xf32>
    %c37 = arith.constant 37 : index
    %163 = memref.load %arg2[%c37] : memref<76xf32, #tpu.memory_space<smem>>
    %164 = vector.broadcast %163 : f32 to vector<2x128xf32>
    %165 = arith.mulf %164, %87 : vector<2x128xf32>
    %166 = arith.addf %162, %165 : vector<2x128xf32>
    %c38 = arith.constant 38 : index
    %167 = memref.load %arg2[%c38] : memref<76xf32, #tpu.memory_space<smem>>
    %168 = vector.broadcast %167 : f32 to vector<2x128xf32>
    %169 = arith.mulf %168, %123 : vector<2x128xf32>
    %170 = arith.addf %166, %169 : vector<2x128xf32>
    %c39 = arith.constant 39 : index
    %171 = memref.load %arg2[%c39] : memref<76xf32, #tpu.memory_space<smem>>
    %172 = vector.broadcast %171 : f32 to vector<2x128xf32>
    %173 = arith.mulf %172, %159 : vector<2x128xf32>
    %174 = arith.addf %170, %173 : vector<2x128xf32>
    %c52 = arith.constant 52 : index
    %175 = memref.load %arg2[%c52] : memref<76xf32, #tpu.memory_space<smem>>
    %176 = vector.broadcast %175 : f32 to vector<2x128xf32>
    %177 = arith.addf %174, %176 : vector<2x128xf32>
    %cst_35 = arith.constant 0.000000e+00 : f32
    %178 = vector.broadcast %cst_35 : f32 to vector<2x128xf32>
    %179 = arith.maximumf %177, %178 : vector<2x128xf32>
    %c40 = arith.constant 40 : index
    %180 = memref.load %arg2[%c40] : memref<76xf32, #tpu.memory_space<smem>>
    %181 = vector.broadcast %180 : f32 to vector<2x128xf32>
    %182 = arith.mulf %181, %51 : vector<2x128xf32>
    %c41 = arith.constant 41 : index
    %183 = memref.load %arg2[%c41] : memref<76xf32, #tpu.memory_space<smem>>
    %184 = vector.broadcast %183 : f32 to vector<2x128xf32>
    %185 = arith.mulf %184, %87 : vector<2x128xf32>
    %186 = arith.addf %182, %185 : vector<2x128xf32>
    %c42 = arith.constant 42 : index
    %187 = memref.load %arg2[%c42] : memref<76xf32, #tpu.memory_space<smem>>
    %188 = vector.broadcast %187 : f32 to vector<2x128xf32>
    %189 = arith.mulf %188, %123 : vector<2x128xf32>
    %190 = arith.addf %186, %189 : vector<2x128xf32>
    %c43 = arith.constant 43 : index
    %191 = memref.load %arg2[%c43] : memref<76xf32, #tpu.memory_space<smem>>
    %192 = vector.broadcast %191 : f32 to vector<2x128xf32>
    %193 = arith.mulf %192, %159 : vector<2x128xf32>
    %194 = arith.addf %190, %193 : vector<2x128xf32>
    %c53 = arith.constant 53 : index
    %195 = memref.load %arg2[%c53] : memref<76xf32, #tpu.memory_space<smem>>
    %196 = vector.broadcast %195 : f32 to vector<2x128xf32>
    %197 = arith.addf %194, %196 : vector<2x128xf32>
    %cst_36 = arith.constant 0.000000e+00 : f32
    %198 = vector.broadcast %cst_36 : f32 to vector<2x128xf32>
    %199 = arith.maximumf %197, %198 : vector<2x128xf32>
    %c44 = arith.constant 44 : index
    %200 = memref.load %arg2[%c44] : memref<76xf32, #tpu.memory_space<smem>>
    %201 = vector.broadcast %200 : f32 to vector<2x128xf32>
    %202 = arith.mulf %201, %51 : vector<2x128xf32>
    %c45 = arith.constant 45 : index
    %203 = memref.load %arg2[%c45] : memref<76xf32, #tpu.memory_space<smem>>
    %204 = vector.broadcast %203 : f32 to vector<2x128xf32>
    %205 = arith.mulf %204, %87 : vector<2x128xf32>
    %206 = arith.addf %202, %205 : vector<2x128xf32>
    %c46 = arith.constant 46 : index
    %207 = memref.load %arg2[%c46] : memref<76xf32, #tpu.memory_space<smem>>
    %208 = vector.broadcast %207 : f32 to vector<2x128xf32>
    %209 = arith.mulf %208, %123 : vector<2x128xf32>
    %210 = arith.addf %206, %209 : vector<2x128xf32>
    %c47 = arith.constant 47 : index
    %211 = memref.load %arg2[%c47] : memref<76xf32, #tpu.memory_space<smem>>
    %212 = vector.broadcast %211 : f32 to vector<2x128xf32>
    %213 = arith.mulf %212, %159 : vector<2x128xf32>
    %214 = arith.addf %210, %213 : vector<2x128xf32>
    %c54 = arith.constant 54 : index
    %215 = memref.load %arg2[%c54] : memref<76xf32, #tpu.memory_space<smem>>
    %216 = vector.broadcast %215 : f32 to vector<2x128xf32>
    %217 = arith.addf %214, %216 : vector<2x128xf32>
    %cst_37 = arith.constant 0.000000e+00 : f32
    %218 = vector.broadcast %cst_37 : f32 to vector<2x128xf32>
    %219 = arith.maximumf %217, %218 : vector<2x128xf32>
    %c48 = arith.constant 48 : index
    %220 = memref.load %arg2[%c48] : memref<76xf32, #tpu.memory_space<smem>>
    %221 = vector.broadcast %220 : f32 to vector<2x128xf32>
    %222 = arith.mulf %221, %51 : vector<2x128xf32>
    %c49 = arith.constant 49 : index
    %223 = memref.load %arg2[%c49] : memref<76xf32, #tpu.memory_space<smem>>
    %224 = vector.broadcast %223 : f32 to vector<2x128xf32>
    %225 = arith.mulf %224, %87 : vector<2x128xf32>
    %226 = arith.addf %222, %225 : vector<2x128xf32>
    %c50 = arith.constant 50 : index
    %227 = memref.load %arg2[%c50] : memref<76xf32, #tpu.memory_space<smem>>
    %228 = vector.broadcast %227 : f32 to vector<2x128xf32>
    %229 = arith.mulf %228, %123 : vector<2x128xf32>
    %230 = arith.addf %226, %229 : vector<2x128xf32>
    %c51 = arith.constant 51 : index
    %231 = memref.load %arg2[%c51] : memref<76xf32, #tpu.memory_space<smem>>
    %232 = vector.broadcast %231 : f32 to vector<2x128xf32>
    %233 = arith.mulf %232, %159 : vector<2x128xf32>
    %234 = arith.addf %230, %233 : vector<2x128xf32>
    %c55 = arith.constant 55 : index
    %235 = memref.load %arg2[%c55] : memref<76xf32, #tpu.memory_space<smem>>
    %236 = vector.broadcast %235 : f32 to vector<2x128xf32>
    %237 = arith.addf %234, %236 : vector<2x128xf32>
    %cst_38 = arith.constant 0.000000e+00 : f32
    %238 = vector.broadcast %cst_38 : f32 to vector<2x128xf32>
    %239 = arith.maximumf %237, %238 : vector<2x128xf32>
    %c56 = arith.constant 56 : index
    %240 = memref.load %arg2[%c56] : memref<76xf32, #tpu.memory_space<smem>>
    %241 = vector.broadcast %240 : f32 to vector<2x128xf32>
    %242 = arith.mulf %241, %179 : vector<2x128xf32>
    %c57 = arith.constant 57 : index
    %243 = memref.load %arg2[%c57] : memref<76xf32, #tpu.memory_space<smem>>
    %244 = vector.broadcast %243 : f32 to vector<2x128xf32>
    %245 = arith.mulf %244, %199 : vector<2x128xf32>
    %246 = arith.addf %242, %245 : vector<2x128xf32>
    %c58 = arith.constant 58 : index
    %247 = memref.load %arg2[%c58] : memref<76xf32, #tpu.memory_space<smem>>
    %248 = vector.broadcast %247 : f32 to vector<2x128xf32>
    %249 = arith.mulf %248, %219 : vector<2x128xf32>
    %250 = arith.addf %246, %249 : vector<2x128xf32>
    %c59 = arith.constant 59 : index
    %251 = memref.load %arg2[%c59] : memref<76xf32, #tpu.memory_space<smem>>
    %252 = vector.broadcast %251 : f32 to vector<2x128xf32>
    %253 = arith.mulf %252, %239 : vector<2x128xf32>
    %254 = arith.addf %250, %253 : vector<2x128xf32>
    %c72 = arith.constant 72 : index
    %255 = memref.load %arg2[%c72] : memref<76xf32, #tpu.memory_space<smem>>
    %256 = vector.broadcast %255 : f32 to vector<2x128xf32>
    %257 = arith.addf %254, %256 : vector<2x128xf32>
    %cst_39 = arith.constant 0.000000e+00 : f32
    %258 = vector.broadcast %cst_39 : f32 to vector<2x128xf32>
    %259 = arith.maximumf %257, %258 : vector<2x128xf32>
    %c60 = arith.constant 60 : index
    %260 = memref.load %arg2[%c60] : memref<76xf32, #tpu.memory_space<smem>>
    %261 = vector.broadcast %260 : f32 to vector<2x128xf32>
    %262 = arith.mulf %261, %179 : vector<2x128xf32>
    %c61 = arith.constant 61 : index
    %263 = memref.load %arg2[%c61] : memref<76xf32, #tpu.memory_space<smem>>
    %264 = vector.broadcast %263 : f32 to vector<2x128xf32>
    %265 = arith.mulf %264, %199 : vector<2x128xf32>
    %266 = arith.addf %262, %265 : vector<2x128xf32>
    %c62 = arith.constant 62 : index
    %267 = memref.load %arg2[%c62] : memref<76xf32, #tpu.memory_space<smem>>
    %268 = vector.broadcast %267 : f32 to vector<2x128xf32>
    %269 = arith.mulf %268, %219 : vector<2x128xf32>
    %270 = arith.addf %266, %269 : vector<2x128xf32>
    %c63 = arith.constant 63 : index
    %271 = memref.load %arg2[%c63] : memref<76xf32, #tpu.memory_space<smem>>
    %272 = vector.broadcast %271 : f32 to vector<2x128xf32>
    %273 = arith.mulf %272, %239 : vector<2x128xf32>
    %274 = arith.addf %270, %273 : vector<2x128xf32>
    %c73 = arith.constant 73 : index
    %275 = memref.load %arg2[%c73] : memref<76xf32, #tpu.memory_space<smem>>
    %276 = vector.broadcast %275 : f32 to vector<2x128xf32>
    %277 = arith.addf %274, %276 : vector<2x128xf32>
    %cst_40 = arith.constant 0.000000e+00 : f32
    %278 = vector.broadcast %cst_40 : f32 to vector<2x128xf32>
    %279 = arith.maximumf %277, %278 : vector<2x128xf32>
    %c64 = arith.constant 64 : index
    %280 = memref.load %arg2[%c64] : memref<76xf32, #tpu.memory_space<smem>>
    %281 = vector.broadcast %280 : f32 to vector<2x128xf32>
    %282 = arith.mulf %281, %179 : vector<2x128xf32>
    %c65 = arith.constant 65 : index
    %283 = memref.load %arg2[%c65] : memref<76xf32, #tpu.memory_space<smem>>
    %284 = vector.broadcast %283 : f32 to vector<2x128xf32>
    %285 = arith.mulf %284, %199 : vector<2x128xf32>
    %286 = arith.addf %282, %285 : vector<2x128xf32>
    %c66 = arith.constant 66 : index
    %287 = memref.load %arg2[%c66] : memref<76xf32, #tpu.memory_space<smem>>
    %288 = vector.broadcast %287 : f32 to vector<2x128xf32>
    %289 = arith.mulf %288, %219 : vector<2x128xf32>
    %290 = arith.addf %286, %289 : vector<2x128xf32>
    %c67 = arith.constant 67 : index
    %291 = memref.load %arg2[%c67] : memref<76xf32, #tpu.memory_space<smem>>
    %292 = vector.broadcast %291 : f32 to vector<2x128xf32>
    %293 = arith.mulf %292, %239 : vector<2x128xf32>
    %294 = arith.addf %290, %293 : vector<2x128xf32>
    %c74 = arith.constant 74 : index
    %295 = memref.load %arg2[%c74] : memref<76xf32, #tpu.memory_space<smem>>
    %296 = vector.broadcast %295 : f32 to vector<2x128xf32>
    %297 = arith.addf %294, %296 : vector<2x128xf32>
    %cst_41 = arith.constant 0.000000e+00 : f32
    %298 = vector.broadcast %cst_41 : f32 to vector<2x128xf32>
    %299 = arith.maximumf %297, %298 : vector<2x128xf32>
    %c68 = arith.constant 68 : index
    %300 = memref.load %arg2[%c68] : memref<76xf32, #tpu.memory_space<smem>>
    %301 = vector.broadcast %300 : f32 to vector<2x128xf32>
    %302 = arith.mulf %301, %179 : vector<2x128xf32>
    %c69 = arith.constant 69 : index
    %303 = memref.load %arg2[%c69] : memref<76xf32, #tpu.memory_space<smem>>
    %304 = vector.broadcast %303 : f32 to vector<2x128xf32>
    %305 = arith.mulf %304, %199 : vector<2x128xf32>
    %306 = arith.addf %302, %305 : vector<2x128xf32>
    %c70 = arith.constant 70 : index
    %307 = memref.load %arg2[%c70] : memref<76xf32, #tpu.memory_space<smem>>
    %308 = vector.broadcast %307 : f32 to vector<2x128xf32>
    %309 = arith.mulf %308, %219 : vector<2x128xf32>
    %310 = arith.addf %306, %309 : vector<2x128xf32>
    %c71 = arith.constant 71 : index
    %311 = memref.load %arg2[%c71] : memref<76xf32, #tpu.memory_space<smem>>
    %312 = vector.broadcast %311 : f32 to vector<2x128xf32>
    %313 = arith.mulf %312, %239 : vector<2x128xf32>
    %314 = arith.addf %310, %313 : vector<2x128xf32>
    %c75 = arith.constant 75 : index
    %315 = memref.load %arg2[%c75] : memref<76xf32, #tpu.memory_space<smem>>
    %316 = vector.broadcast %315 : f32 to vector<2x128xf32>
    %317 = arith.addf %314, %316 : vector<2x128xf32>
    %cst_42 = arith.constant 0.000000e+00 : f32
    %318 = vector.broadcast %cst_42 : f32 to vector<2x128xf32>
    %319 = arith.maximumf %317, %318 : vector<2x128xf32>
    %c0_43 = arith.constant 0 : index
    %c0_44 = arith.constant 0 : index
    %c0_45 = arith.constant 0 : index
    %c0_46 = arith.constant 0 : index
    %320 = vector.load %arg4[%c0_43, %c0_44, %c0_45, %c0_46] : memref<1x4x2x128xf32, #tpu.memory_space<vmem>>, vector<1x1x2x128xf32>
    %321 = vector.shape_cast %320 : vector<1x1x2x128xf32> to vector<2x128xf32>
    %322 = vector.shape_cast %259 : vector<2x128xf32> to vector<1x1x2x128xf32>
    tpu.vector_store %arg4[%c0_43, %c0_44, %c0_45, %c0_46], %322 {strides = array<i32>} : memref<1x4x2x128xf32, #tpu.memory_space<vmem>>, vector<1x1x2x128xf32>,
    %c0_47 = arith.constant 0 : index
    %c1_48 = arith.constant 1 : index
    %c0_49 = arith.constant 0 : index
    %c0_50 = arith.constant 0 : index
    %323 = vector.load %arg4[%c0_47, %c1_48, %c0_49, %c0_50] : memref<1x4x2x128xf32, #tpu.memory_space<vmem>>, vector<1x1x2x128xf32>
    %324 = vector.shape_cast %323 : vector<1x1x2x128xf32> to vector<2x128xf32>
    %325 = vector.shape_cast %279 : vector<2x128xf32> to vector<1x1x2x128xf32>
    tpu.vector_store %arg4[%c0_47, %c1_48, %c0_49, %c0_50], %325 {strides = array<i32>} : memref<1x4x2x128xf32, #tpu.memory_space<vmem>>, vector<1x1x2x128xf32>,
    %c0_51 = arith.constant 0 : index
    %c2_52 = arith.constant 2 : index
    %c0_53 = arith.constant 0 : index
    %c0_54 = arith.constant 0 : index
    %326 = vector.load %arg4[%c0_51, %c2_52, %c0_53, %c0_54] : memref<1x4x2x128xf32, #tpu.memory_space<vmem>>, vector<1x1x2x128xf32>
    %327 = vector.shape_cast %326 : vector<1x1x2x128xf32> to vector<2x128xf32>
    %328 = vector.shape_cast %299 : vector<2x128xf32> to vector<1x1x2x128xf32>
    tpu.vector_store %arg4[%c0_51, %c2_52, %c0_53, %c0_54], %328 {strides = array<i32>} : memref<1x4x2x128xf32, #tpu.memory_space<vmem>>, vector<1x1x2x128xf32>,
    %c0_55 = arith.constant 0 : index
    %c3_56 = arith.constant 3 : index
    %c0_57 = arith.constant 0 : index
    %c0_58 = arith.constant 0 : index
    %329 = vector.load %arg4[%c0_55, %c3_56, %c0_57, %c0_58] : memref<1x4x2x128xf32, #tpu.memory_space<vmem>>, vector<1x1x2x128xf32>
    %330 = vector.shape_cast %329 : vector<1x1x2x128xf32> to vector<2x128xf32>
    %331 = vector.shape_cast %319 : vector<2x128xf32> to vector<1x1x2x128xf32>
    tpu.vector_store %arg4[%c0_55, %c3_56, %c0_57, %c0_58], %331 {strides = array<i32>} : memref<1x4x2x128xf32, #tpu.memory_space<vmem>>, vector<1x1x2x128xf32>,
    return
  }
  func.func @transform_0(%arg0: i32, %arg1: i32) -> i32 {
    %c0_i32 = arith.constant 0 : i32
    %c0_i32_0 = arith.constant 0 : i32
    return %c0_i32 : i32
  }
  func.func @transform_1(%arg0: i32, %arg1: i32) -> (i32, i32, i32, i32) {
    %c0_i32 = arith.constant 0 : i32
    %c0_i32_0 = arith.constant 0 : i32
    %c0_i32_1 = arith.constant 0 : i32
    return %arg0, %c0_i32, %arg1, %c0_i32_0 : i32, i32, i32, i32
  }
  func.func @transform_2(%arg0: i32, %arg1: i32) -> (i32, i32, i32, i32) {
    %c0_i32 = arith.constant 0 : i32
    %c0_i32_0 = arith.constant 0 : i32
    %c0_i32_1 = arith.constant 0 : i32
    return %arg0, %c0_i32, %arg1, %c0_i32_0 : i32, i32, i32, i32
  }
}

</mosaic_0001>

<bundles_post_ra>
// kernel: tpu_custom_call.1
= control target key start
LH: loop header
LB: loop body
LE: loop exit
PB: predicated region body
PF: predicated region fallthrough
CT: control target
= control target key end

     0   :  { %7 = vsyncpa [#allocation5], 0  ;;  %s1296_s0 = inlined_call_operand.hbm [shape: f32[76], index: 0, kind: input, shape index: {}]   ;;  %s1297_s1 = inlined_call_operand.hbm [shape: f32[2,8,2,128], index: 1, kind: input, shape index: {}]   ;;  %s1298_s2 = inlined_call_operand.hbm [shape: f32[2,4,2,128], index: 2, kind: output, shape index: {}]  }
   0x1   :  { %8 = vsyncpa [#allocation3], 0 }
   0x2   :  { %10 = vsyncpa [#allocation3 + $0x1], 0 }
   0x3   :  { %11 = vsyncpa [#allocation4], 0 }
   0x4   :  { %13 = vsyncpa [#allocation4 + $0x1], 0  ;;  %s957_s9 = smov 0   ;;  %s959_s10 = smov 0  }
   0x5   :  { %s961_s11 = smov 0   ;;  %s963_s12 = smov 0  }
   0x6   :  { %s965_s13 = smov 0   ;;  %s967_s14 = smov 0  }
   0x7 LB: > { %s623_s15 = sadd.s32 4294967295, %s935_s14   ;;  %s624_s16 = sadd.s32 4294967294, %s935_s14   ;;  %s935_s14 = sphi %s967_s14, %s19_s14   ;;  %s931_s13 = sphi %s965_s13, %s1310_s13   ;;  %s927_s12 = sphi %s963_s12, %s1309_s12   ;;  %s923_s11 = sphi %s961_s11, %s1308_s11   ;;  %s919_s10 = sphi %s959_s10, %s1307_s10   ;;  %s915_s9 = sphi %s957_s9, %s1306_s9  }
   0x8   : > { %s61_s17 = sadd.s32 1, %s923_s11  ;;  %p68_p0 = scmp.ne.s32.totalorder %s923_s11, %s919_s10 }
   0x9   : > { %p69_p1 = scmp.eq.s32.totalorder %s935_s14, 0  ;;  %p74_p2 = scmp.ne.s32.totalorder %s919_s10, %s915_s9 }
   0xa   : > { %p995_p3 = scmp.eq.s32.totalorder %s623_s15, 0  ;;  %p100_p4 = scmp.eq.s32.totalorder %s623_s15, 1 }
   0xb   : > { %p999_p5 = por %p69_p1, %p68_p0  ;;  %p106_p6 = scmp.eq.s32.totalorder %s624_s16, 1 }
   0xc   : > { %p1005_p7 = por %p995_p3, %p74_p2  ;;  %p1009_p8 = por %p100_p4, %p68_p0 }
   0xd   : > { %p1013_p9 = por %p106_p6, %p74_p2  ;;  %p625_p10 = scmp.ge.s32.totalorder %s935_s14, 1 }
   0xe   : > { %p113_p11 = scmp.lt.s32.totalorder %s935_s14, 3  ;;  %s125_s25 = sshll.u32 %s1296_s0, 4  ;;  %s126_s25 = int_to_ptr.hbm [resolvable:$true] %s125_s25 }
   0xf   : > { %p627_p13 = scmp.ge.s32.totalorder %s935_s14, 2  ;;  %p748_p0 = scmp.lt.s32.totalorder %s935_s14, 2 }
  0x10   : > { %p1022_p12 = pnand %p625_p10, %p113_p11  ;;  %s31_s28 = sadd.s32 1, %s931_s13 }
  0x11   : > { %p1032_p2 = pnand %p748_p0, %p999_p5  ;;  %p33_p6 = scmp.ge.s32.totalorder %s31_s28, 2 }
  0x12   : > { %p735_p1 = pneg %p1022_p12  ;;  %s136_s29 = sand.u32 1, %s923_s11  }
  0x13   : > { %s937_s30 = smov [#allocation2]   ;;  %s1312_s28 = smov (%p33_p6, %s31_s28), 0 }
  0x14   : > { %p736_p4 = pnand %p735_p1, %p995_p3  ;;  %s628_s3 = sshll.u32 %s136_s29, 4 }
  0x15   : > { %s56_s4 = ssub.s32 %s931_s13, %s1312_s28  ;;  %s725_s5 = sshll.u32 %s931_s13, 4 }
  0x16   : > { %738 = dma.hbm_to_smem (!%p736_p4), %s126_s25, 16, %s937_s30, [#allocation5]  }
  0x17   : > { %p59_p10 = scmp.eq.s32.totalorder %s56_s4, 0  ;;  %s146_s8 = scalar_lea.hbm %s1297_s1, %s725_s5 }
  0x18   : > { %s140_s15 = scalar_lea.vmem [#allocation6], %s628_s3  ;;  %s147_s23 = sshll.u32 %s146_s8, 4  ;;  %s148_s23 = int_to_ptr.hbm [resolvable:$true] %s147_s23 }
  0x19   : > { %s149_s16 = sshll.u32 %s140_s15, 4  ;;  %s137_s24 = scalar_lea.sflag [#allocation3], %s136_s29  ;;  %s150_s16 = int_to_ptr.vmem [resolvable:$true] %s149_s16 }
  0x1a   : > { %s1051_s19 = scalar_select %p59_p10, %s923_s11, %s61_s17  }
  0x1b   : > { %s938_s25 = smov 32   ;;  %s939_s30 = smov 2  }
  0x1c   : > { %742 = dma.hbm_to_vmem [thread:$0]  (!%p1032_p2), %s148_s23, 256, %s150_s16, %s137_s24, %s938_s25, %s938_s25, %s939_s30  }
  0x1d   : > { %161 = sbr.rel (%p1022_p12) target bundleno = 136 (0x88), region = 28 }
  0x22   : > { %902 = dma.done.wait (%p995_p3), [#allocation5], 16  }
  0x23   : > { %904 = vsyncadd (%p995_p3), [#allocation5], 4294967280  ;;  %s1062_s17 = sand.u32 1, %s919_s10  }
  0x24   : > { %s633_s29 = sshll.u32 %s1062_s17, 4  ;;  %s169_s3 = scalar_lea.sflag [#allocation3], %s1062_s17 }
  0x25   : > { %s1066_s4 = scalar_lea.vmem [#allocation6], %s633_s29 }
  0x26   : > { %906 = dma.done.wait (%p1005_p7), %s169_s3, 256  }
  0x27   : > { %908 = vsyncadd (%p1005_p7), %s169_s3, 4294967040 }
  0x28   : > { %178 = sfence }
  0x29   : > { %s210_s26 = sld [smem:[#allocation2]]  ;;  %v1073_v0 = vld [vmem:[%s1066_s4] sm:$0x3]  ;;  %v1076_v1 = vld [vmem:[%s1066_s4 + $0x2] sm:$0x3] }
  0x2a   : > { %s642_s18 = sld [smem:[#allocation2 + $0x1]]  ;;  %v1081_v2 = vld [vmem:[%s1066_s4 + $0x4] sm:$0x3]  ;;  %v1089_v6 = vld [vmem:[%s1066_s4 + $0x6] sm:$0x3] }
  0x2b   : > { %s643_s27 = sld [smem:[#allocation2 + $0x2]]  ;;  %v1097_v13 = vld [vmem:[%s1066_s4 + $0x8] sm:$0x3]  ;;  %v1102_v16 = vld [vmem:[%s1066_s4 + $0xa] sm:$0x3] }
  0x2c   : > { %s644_s5 = sld [smem:[#allocation2 + $0x3]]  ;;  %v1118_v29 = vld [vmem:[%s1066_s4 + $0xc] sm:$0x3]  ;;  %v1128_v39 = vld [vmem:[%s1066_s4 + $0xe] sm:$0x3] }
  0x2d   : > { %s645_s6 = sld [smem:[#allocation2 + $0x4]] }
  0x2e   : > { %s1078_s7 = sld [smem:[#allocation2 + $0x5]] }
  0x2f   : > { %v211_v3 = vstv %s210_s26  ;;  %s1083_s20 = sld [smem:[#allocation2 + $0x6]] }
  0x30   : > { %v212_v4 = vmul.f32 %v211_v3, %v1073_v0  ;;  %v214_v5 = vstv %s642_s18  ;;  %s1086_s8 = sld [smem:[#allocation2 + $0x7]] }
  0x31   : > { %v215_v7 = vmul.f32 %v1076_v1, %v214_v5  ;;  %v218_v8 = vstv %s643_s27  ;;  %s1092_s15 = sld [smem:[#allocation2 + $0x20]] }
  0x32   : > { %v219_v9 = vmul.f32 %v1081_v2, %v218_v8  ;;  %v222_v10 = vstv %s644_s5  ;;  %s650_s16 = sld [smem:[#allocation2 + $0x8]] }
  0x33   : > { %v216_v11 = vadd.f32 %v215_v7, %v212_v4  ;;  %s651_s23 = sld [smem:[#allocation2 + $0x9]]  ;;  %v223_v12 = vmul.f32 %v1089_v6, %v222_v10  ;;  %v226_v15 = vstv %s645_s6 }
  0x34   : > { %s652_s24 = sld [smem:[#allocation2 + $0xa]]  ;;  %v227_v18 = vmul.f32 %v1097_v13, %v226_v15  ;;  %v230_v19 = vstv %s1078_s7 }
  0x35   : > { %v220_v14 = vadd.f32 %v219_v9, %v216_v11  ;;  %s653_s25 = sld [smem:[#allocation2 + $0xb]]  ;;  %v231_v25 = vmul.f32 %v1102_v16, %v230_v19  ;;  %v234_v26 = vstv %s1083_s20 }
  0x36   : > { %s654_s30 = sld [smem:[#allocation2 + $0xc]]  ;;  %v235_v38 = vmul.f32 %v1118_v29, %v234_v26  ;;  %v238_v41 = vstv %s1086_s8 }
  0x37   : > { %s1099_s29 = sld [smem:[#allocation2 + $0xd]]  ;;  %v224_v17 = vadd.f32 %v223_v12, %v220_v14  ;;  %v239_v50 = vmul.f32 %v1128_v39, %v238_v41  ;;  %v242_v5 = vstv %s1092_s15 }
  0x38   : > { %v246_v20 = vstv %s650_s16  ;;  %s1106_s3 = sld [smem:[#allocation2 + $0xe]] }
  0x39   : > { %v247_v21 = vmul.f32 %v246_v20, %v1073_v0  ;;  %v249_v22 = vstv %s651_s23  ;;  %s1109_s26 = sld [smem:[#allocation2 + $0xf]]  ;;  %v228_v30 = vadd.f32 %v227_v18, %v224_v17 }
  0x3a   : > { %v250_v23 = vmul.f32 %v1076_v1, %v249_v22  ;;  %v253_v24 = vstv %s652_s24  ;;  %s1112_s18 = sld [smem:[#allocation2 + $0x21]] }
  0x3b   : > { %v254_v27 = vmul.f32 %v1081_v2, %v253_v24  ;;  %v257_v28 = vstv %s653_s25  ;;  %s659_s27 = sld [smem:[#allocation2 + $0x10]]  ;;  %v232_v40 = vadd.f32 %v231_v25, %v228_v30 }
  0x3c   : > { %v251_v31 = vadd.f32 %v250_v23, %v247_v21  ;;  %v258_v32 = vmul.f32 %v1089_v6, %v257_v28  ;;  %v261_v33 = vstv %s654_s30  ;;  %s660_s5 = sld [smem:[#allocation2 + $0x11]] }
  0x3d   : > { %v265_v34 = vstv %s1099_s29  ;;  %s661_s6 = sld [smem:[#allocation2 + $0x12]]  ;;  %v262_v36 = vmul.f32 %v1097_v13, %v261_v33  ;;  %v236_v53 = vadd.f32 %v235_v38, %v232_v40 }
  0x3e   : > { %v255_v35 = vadd.f32 %v254_v27, %v251_v31  ;;  %v269_v37 = vstv %s1106_s3  ;;  %s662_s7 = sld [smem:[#allocation2 + $0x13]]  ;;  %v266_v43 = vmul.f32 %v1102_v16, %v265_v34 }
  0x3f   : > { %s1125_s20 = sld [smem:[#allocation2 + $0x14]]  ;;  %v270_v44 = vmul.f32 %v1118_v29, %v269_v37  ;;  %v273_v47 = vstv %s1109_s26  ;;  %v240_v4 = vadd.f32 %v239_v50, %v236_v53 }
  0x40   : > { %v259_v42 = vadd.f32 %v258_v32, %v255_v35  ;;  %s1132_s16 = sld [smem:[#allocation2 + $0x15]]  ;;  %v274_v57 = vmul.f32 %v1128_v39, %v273_v47  ;;  %v277_v12 = vstv %s1112_s18 }
  0x41   : > { %v281_v45 = vstv %s659_s27  ;;  %s1135_s23 = sld [smem:[#allocation2 + $0x16]]  ;;  %v243_v20 = vadd.f32 %v242_v5, %v240_v4 }
  0x42   : > { %v263_v46 = vadd.f32 %v262_v36, %v259_v42  ;;  %v282_v48 = vmul.f32 %v281_v45, %v1073_v0  ;;  %v284_v49 = vstv %s660_s5  ;;  %s1139_s4 = sld [smem:[#allocation2 + $0x17]] }
  0x43   : > { %v285_v51 = vmul.f32 %v1076_v1, %v284_v49  ;;  %v288_v52 = vstv %s661_s6  ;;  %s1143_s8 = sld [smem:[#allocation2 + $0x22]] }
  0x44   : > { %v267_v54 = vadd.f32 %v266_v43, %v263_v46  ;;  %v289_v55 = vmul.f32 %v1081_v2, %v288_v52  ;;  %v292_v56 = vstv %s662_s7  ;;  %s668_s24 = sld [smem:[#allocation2 + $0x18]] }
  0x45   : > { %v286_v58 = vadd.f32 %v285_v51, %v282_v48  ;;  %v293_v59 = vmul.f32 %v1089_v6, %v292_v56  ;;  %v296_v60 = vstv %s1125_s20  ;;  %s669_s25 = sld [smem:[#allocation2 + $0x19]] }
  0x46   : > { %v271_v61 = vadd.f32 %v270_v44, %v267_v54  ;;  %v300_v62 = vstv %s1132_s16  ;;  %s670_s30 = sld [smem:[#allocation2 + $0x1a]]  ;;  %v297_v3 = vmul.f32 %v1097_v13, %v296_v60 }
  0x47   : > { %v290_v63 = vadd.f32 %v289_v55, %v286_v58  ;;  %s671_s29 = sld [smem:[#allocation2 + $0x1b]]  ;;  %v304_v7 = vstv %s1135_s23  ;;  %v301_v10 = vmul.f32 %v1102_v16, %v300_v62 }
  0x48   : > { %s1153_s3 = sld [smem:[#allocation2 + $0x1c]]  ;;  %v275_v8 = vadd.f32 %v274_v57, %v271_v61  ;;  %v308_v11 = vstv %s1139_s4  ;;  %v305_v17 = vmul.f32 %v1118_v29, %v304_v7 }
  0x49   : > { %v294_v9 = vadd.f32 %v293_v59, %v290_v63  ;;  %s1157_s26 = sld [smem:[#allocation2 + $0x1d]]  ;;  %v309_v21 = vmul.f32 %v1128_v39, %v308_v11 }
  0x4a   : > { %v316_v14 = vstv %s668_s24  ;;  %s1160_s27 = sld [smem:[#allocation2 + $0x1e]]  ;;  %v278_v24 = vadd.f32 %v277_v12, %v275_v8 }
  0x4b   : > { %v298_v15 = vadd.f32 %v297_v3, %v294_v9  ;;  %v317_v18 = vmul.f32 %v316_v14, %v1073_v0  ;;  %v319_v19 = vstv %s669_s25  ;;  %s1164_s15 = sld [smem:[#allocation2 + $0x1f]] }
  0x4c   : > { %v320_v22 = vmul.f32 %v1076_v1, %v319_v19  ;;  %v323_v23 = vstv %s670_s30  ;;  %s1168_s18 = sld [smem:[#allocation2 + $0x23]]  ;;  %v312_v1 = vstv %s1143_s8  ;;  %v1182_v35 = vmax.f32 %v278_v24, 0.0 }
  0x4d   : > { %v302_v25 = vadd.f32 %v301_v10, %v298_v15  ;;  %v324_v26 = vmul.f32 %v1081_v2, %v323_v23  ;;  %v327_v27 = vstv %s671_s29  ;;  %s677_s5 = sld [smem:[#allocation2 + $0x24]]  ;;  %v1180_v2 = vmax.f32 %v243_v20, 0.0 }
  0x4e   : > { %v321_v0 = vadd.f32 %v320_v22, %v317_v18  ;;  %v328_v28 = vmul.f32 %v1089_v6, %v327_v27  ;;  %v331_v30 = vstv %s1153_s3  ;;  %s678_s6 = sld [smem:[#allocation2 + $0x25]] }
  0x4f   : > { %v306_v31 = vadd.f32 %v305_v17, %v302_v25  ;;  %v335_v32 = vstv %s1157_s26  ;;  %s1174_s7 = sld [smem:[#allocation2 + $0x26]]  ;;  %v332_v34 = vmul.f32 %v1097_v13, %v331_v30 }
  0x50   : > { %v325_v33 = vadd.f32 %v324_v26, %v321_v0  ;;  %s1178_s20 = sld [smem:[#allocation2 + $0x27]]  ;;  %v339_v37 = vstv %s1160_s27  ;;  %v336_v38 = vmul.f32 %v1102_v16, %v335_v32 }
  0x51   : > { %v310_v36 = vadd.f32 %v309_v21, %v306_v31  ;;  %s1185_s16 = sld [smem:[#allocation2 + $0x34]]  ;;  %v343_v41 = vstv %s1164_s15  ;;  %v340_v43 = vmul.f32 %v1118_v29, %v339_v37 }
  0x52   : > { %v329_v6 = vadd.f32 %v328_v28, %v325_v33  ;;  %s682_s23 = sld [smem:[#allocation2 + $0x28]]  ;;  %v344_v48 = vmul.f32 %v1128_v39, %v343_v41  ;;  %v347_v51 = vstv %s1168_s18 }
  0x53   : > { %v313_v40 = vadd.f32 %v312_v1, %v310_v36  ;;  %v351_v42 = vstv %s677_s5  ;;  %s683_s4 = sld [smem:[#allocation2 + $0x29]] }
  0x54   : > { %v333_v13 = vadd.f32 %v332_v34, %v329_v6  ;;  %v354_v44 = vstv %s678_s6  ;;  %s684_s8 = sld [smem:[#allocation2 + $0x2a]]  ;;  %v352_v46 = vmul.f32 %v351_v42, %v1180_v2 }
  0x55   : > { %v1190_v45 = vmax.f32 %v313_v40, 0.0  ;;  %v355_v47 = vmul.f32 %v354_v44, %v1182_v35  ;;  %s1194_s24 = sld [smem:[#allocation2 + $0x2b]]  ;;  %v358_v49 = vstv %s1174_s7 }
  0x56   : > { %v337_v16 = vadd.f32 %v336_v38, %v333_v13  ;;  %s1198_s25 = sld [smem:[#allocation2 + $0x35]]  ;;  %v362_v62 = vstv %s1178_s20 }
  0x57   : > { %s687_s30 = sld [smem:[#allocation2 + $0x2c]]  ;;  %v356_v52 = vadd.f32 %v355_v47, %v352_v46  ;;  %v359_v53 = vmul.f32 %v358_v49, %v1190_v45  ;;  %v366_v17 = vstv %s1185_s16 }
  0x58   : > { %v341_v50 = vadd.f32 %v340_v43, %v337_v16  ;;  %v370_v29 = vstv %s682_s23  ;;  %s688_s29 = sld [smem:[#allocation2 + $0x2d]] }
  0x59   : > { %v371_v54 = vmul.f32 %v370_v29, %v1180_v2  ;;  %v373_v55 = vstv %s683_s4  ;;  %s689_s3 = sld [smem:[#allocation2 + $0x2e]]  ;;  %v360_v61 = vadd.f32 %v359_v53, %v356_v52 }
  0x5a   : > { %v345_v56 = vadd.f32 %v344_v48, %v341_v50  ;;  %v374_v39 = vmul.f32 %v373_v55, %v1182_v35  ;;  %v377_v57 = vstv %s684_s8  ;;  %s690_s26 = sld [smem:[#allocation2 + $0x2f]] }
  0x5b   : > { %v378_v58 = vmul.f32 %v377_v57, %v1190_v45  ;;  %s1205_s27 = sld [smem:[#allocation2 + $0x36]]  ;;  %v381_v63 = vstv %s1194_s24 }
  0x5c   : > { %v348_v59 = vadd.f32 %v347_v51, %v345_v56  ;;  %v375_v60 = vadd.f32 %v374_v39, %v371_v54  ;;  %s1207_s15 = sld [smem:[#allocation2 + $0x30]]  ;;  %v385_v18 = vstv %s1198_s25 }
  0x5d   : > { %v389_v3 = vstv %s687_s30  ;;  %s693_s18 = sld [smem:[#allocation2 + $0x31]] }
  0x5e   : > { %v349_v4 = vmax.f32 %v348_v59, 0.0  ;;  %v379_v5 = vadd.f32 %v378_v58, %v375_v60  ;;  %v390_v7 = vmul.f32 %v389_v3, %v1180_v2  ;;  %v392_v8 = vstv %s688_s29  ;;  %s694_s5 = sld [smem:[#allocation2 + $0x32]] }
  0x5f   : > { %v393_v9 = vmul.f32 %v392_v8, %v1182_v35  ;;  %v396_v10 = vstv %s689_s3  ;;  %s1213_s6 = sld [smem:[#allocation2 + $0x33]] }
  0x60   : > { %v363_v11 = vmul.f32 %v362_v62, %v349_v4  ;;  %v382_v12 = vmul.f32 %v381_v63, %v349_v4  ;;  %v397_v14 = vmul.f32 %v396_v10, %v1190_v45  ;;  %v400_v15 = vstv %s690_s26  ;;  %s1216_s7 = sld [smem:[#allocation2 + $0x37]] }
  0x61   : > { %v394_v19 = vadd.f32 %v393_v9, %v390_v7  ;;  %v401_v20 = vmul.f32 %v400_v15, %v349_v4  ;;  %s697_s20 = sld [smem:[#allocation2 + $0x38]]  ;;  %v404_v25 = vstv %s1205_s27 }
  0x62   : > { %v364_v21 = vadd.f32 %v363_v11, %v360_v61  ;;  %v383_v22 = vadd.f32 %v382_v12, %v379_v5  ;;  %v408_v23 = vstv %s1207_s15  ;;  %s698_s23 = sld [smem:[#allocation2 + $0x39]] }
  0x63   : > { %v398_v24 = vadd.f32 %v397_v14, %v394_v19  ;;  %v409_v26 = vmul.f32 %v408_v23, %v1180_v2  ;;  %v411_v27 = vstv %s693_s18  ;;  %s699_s4 = sld [smem:[#allocation2 + $0x3a]] }
  0x64   : > { %v367_v0 = vadd.f32 %v366_v17, %v364_v21  ;;  %v386_v28 = vadd.f32 %v385_v18, %v383_v22  ;;  %v412_v30 = vmul.f32 %v411_v27, %v1182_v35  ;;  %v415_v31 = vstv %s694_s5  ;;  %s1224_s16 = sld [smem:[#allocation2 + $0x3b]] }
  0x65   : > { %v402_v32 = vadd.f32 %v401_v20, %v398_v24  ;;  %v416_v1 = vmul.f32 %v415_v31, %v1190_v45  ;;  %v419_v33 = vstv %s1213_s6  ;;  %s1228_s8 = sld [smem:[#allocation2 + $0x48]] }
  0x66   : > { %v1230_v34 = vmax.f32 %v367_v0, 0.0  ;;  %v1232_v36 = vmax.f32 %v386_v28, 0.0  ;;  %v413_v2 = vadd.f32 %v412_v30, %v409_v26  ;;  %v420_v37 = vmul.f32 %v419_v33, %v349_v4  ;;  %s702_s24 = sld [smem:[#allocation2 + $0x3c]] }
  0x67   : > { %v405_v6 = vadd.f32 %v404_v25, %v402_v32  ;;  %v427_v38 = vstv %s697_s20  ;;  %s703_s25 = sld [smem:[#allocation2 + $0x3d]]  ;;  %v423_v13 = vstv %s1216_s7  ;;  %s634_s20 = sshll.u32 %s1062_s17, 3 }
  0x68   : > { %v417_v35 = vadd.f32 %v416_v1, %v413_v2  ;;  %v428_v40 = vmul.f32 %v427_v38, %v1230_v34  ;;  %v430_v41 = vstv %s698_s23  ;;  %s704_s30 = sld [smem:[#allocation2 + $0x3e]] }
  0x69   : > { %v1235_v42 = vmax.f32 %v405_v6, 0.0  ;;  %v431_v43 = vmul.f32 %v430_v41, %v1232_v36  ;;  %v434_v44 = vstv %s699_s4  ;;  %s705_s29 = sld [smem:[#allocation2 + $0x3f]] }
  0x6a   : > { %v421_v45 = vadd.f32 %v420_v37, %v417_v35  ;;  %s1239_s3 = sld [smem:[#allocation2 + $0x49]]  ;;  %v438_v49 = vstv %s1224_s16 }
  0x6b   : > { %v432_v46 = vadd.f32 %v431_v43, %v428_v40  ;;  %v435_v47 = vmul.f32 %v434_v44, %v1235_v42  ;;  %s707_s26 = sld [smem:[#allocation2 + $0x40]]  ;;  %v442_v59 = vstv %s1228_s8  ;;  %s194_s8 = scalar_lea.vmem [#allocation7], %s634_s20 }
  0x6c   : > { %v424_v16 = vadd.f32 %v423_v13, %v421_v45  ;;  %v446_v48 = vstv %s702_s24  ;;  %s708_s27 = sld [smem:[#allocation2 + $0x41]]  ;;  %s726_s24 = sshll.u32 %s927_s12, 3 }
  0x6d   : > { %v447_v50 = vmul.f32 %v446_v48, %v1230_v34  ;;  %v449_v51 = vstv %s703_s25  ;;  %s709_s15 = sld [smem:[#allocation2 + $0x42]]  ;;  %v436_v52 = vadd.f32 %v435_v47, %v432_v46 }
  0x6e   : > { %v425_v29 = vmax.f32 %v424_v16, 0.0  ;;  %v450_v53 = vmul.f32 %v449_v51, %v1232_v36  ;;  %v453_v54 = vstv %s704_s30  ;;  %s710_s18 = sld [smem:[#allocation2 + $0x43]] }
  0x6f   : > { %v454_v55 = vmul.f32 %v453_v54, %v1235_v42  ;;  %v457_v56 = vstv %s705_s29  ;;  %s1246_s5 = sld [smem:[#allocation2 + $0x4a]]  ;;  %s522_s29 = scalar_lea.hbm %s1298_s2, %s726_s24 }
  0x70   : > { %v439_v39 = vmul.f32 %v438_v49, %v425_v29  ;;  %v451_v57 = vadd.f32 %v450_v53, %v447_v50  ;;  %v458_v58 = vmul.f32 %v457_v56, %v425_v29  ;;  %s712_s6 = sld [smem:[#allocation2 + $0x44]]  ;;  %v461_v4 = vstv %s1239_s3  ;;  %s523_s3 = sshll.u32 %s194_s8, 4  ;;  %s524_s3 = int_to_ptr.vmem [resolvable:$true] %s523_s3 }
  0x71   : > { %v465_v60 = vstv %s707_s26  ;;  %s713_s7 = sld [smem:[#allocation2 + $0x45]]  ;;  %s525_s12 = sshll.u32 %s522_s29, 4  ;;  %s526_s12 = int_to_ptr.hbm [resolvable:$true] %s525_s12 }
  0x72   : > { %v440_v61 = vadd.f32 %v439_v39, %v436_v52  ;;  %v455_v62 = vadd.f32 %v454_v55, %v451_v57  ;;  %v466_v63 = vmul.f32 %v465_v60, %v1230_v34  ;;  %v468_v3 = vstv %s708_s27  ;;  %s714_s23 = sld [smem:[#allocation2 + $0x46]]  ;;  %s510_s26 = scalar_lea.sflag [#allocation4], %s1062_s17 }
  0x73   : > { %v469_v5 = vmul.f32 %v468_v3, %v1232_v36  ;;  %v472_v7 = vstv %s709_s15  ;;  %s715_s4 = sld [smem:[#allocation2 + $0x47]]  ;;  %s863_s27 = sshra.s32 %s526_s12, 4  ;;  %s864_s27 = int_to_ptr.hbm [resolvable:$true] %s863_s27 }
  0x74   : > { %v443_v8 = vadd.f32 %v442_v59, %v440_v61  ;;  %v459_v9 = vadd.f32 %v458_v58, %v455_v62  ;;  %v473_v10 = vmul.f32 %v472_v7, %v1235_v42  ;;  %v476_v11 = vstv %s710_s18  ;;  %s716_s16 = sld [smem:[#allocation2 + $0x4b]]  ;;  %s865_s15 = scalar_lea.hbm %s864_s27, 8 }
  0x75   : > { %v470_v12 = vadd.f32 %v469_v5, %v466_v63  ;;  %v477_v14 = vmul.f32 %v476_v11, %v425_v29  ;;  %v480_v23 = vstv %s1246_s5  ;;  %p866_p3 = scmp.ne.s32.totalorder %s864_s27, %s865_s15  ;;  %p870_p11 = scmp.lt.s32.totalorder %s864_s27, %s1298_s2 }
  0x76   : > { %v444_v15 = vmax.f32 %v443_v8, 0.0  ;;  %v462_v17 = vadd.f32 %v461_v4, %v459_v9  ;;  %v484_v18 = vstv %s712_s6  ;;  %s869_s6 = scalar_lea.hbm %s1298_s2, 16 }
  0x77   : > { %v474_v19 = vadd.f32 %v473_v10, %v470_v12  ;;  %v485_v20 = vmul.f32 %v484_v18, %v1230_v34  ;;  %v487_v21 = vstv %s713_s7  ;;  %p867_p5 = pnand %p866_p3, %p1009_p8  ;;  %p871_p12 = scmp.lt.s32.totalorder %s869_s6, %s865_s15 }
  0x78   : > { %502 = vst [vmem:[%s194_s8] sm:$0x3] %v444_v15  ;;  %v463_v22 = vmax.f32 %v462_v17, 0.0  ;;  %v488_v24 = vmul.f32 %v487_v21, %v1232_v36  ;;  %v491_v25 = vstv %s714_s23 }
  0x79   : > { %v478_v26 = vadd.f32 %v477_v14, %v474_v19  ;;  %v492_v27 = vmul.f32 %v491_v25, %v1235_v42  ;;  %v495_v0 = vstv %s715_s4  ;;  %p868_p7 = pneg %p867_p5  ;;  %p872_p0 = por %p871_p12, %p870_p11 }
  0x7a   : > { %717 = vst [vmem:[%s194_s8 + $0x2] sm:$0x3] %v463_v22  ;;  %v489_v28 = vadd.f32 %v488_v24, %v485_v20  ;;  %v496_v30 = vmul.f32 %v495_v0, %v425_v29  ;;  %v499_v33 = vstv %s716_s16 }
  0x7b   : > { %v481_v31 = vadd.f32 %v480_v23, %v478_v26  ;;  %p873_p1 = pnand %p872_p0, %p868_p7 }
  0x7c   : > { %v493_v32 = vadd.f32 %v492_v27, %v489_v28 }
  0x7d   : > { %v482_v1 = vmax.f32 %v481_v31, 0.0 }
  0x7e   : > { %v497_v34 = vadd.f32 %v496_v30, %v493_v32 }
  0x7f   : > { %718 = vst [vmem:[%s194_s8 + $0x4] sm:$0x3] %v482_v1 }
  0x80   : > { %v500_v36 = vadd.f32 %v499_v33, %v497_v34 }
  0x82   : > { %v501_v2 = vmax.f32 %v500_v36, 0.0 }
  0x84   : > { %719 = vst [vmem:[%s194_s8 + $0x6] sm:$0x3] %v501_v2 }
  0x85   : > { %876 = shalt.err (!%p873_p1)
}
  0x86   : > { %s940_s17 = smov 32   ;;  %s941_s23 = smov 2  }
  0x87   : > { %733 = dma.vmem_to_hbm [thread:$0]  (%p1009_p8), %s524_s3, 128, %s526_s12, %s510_s26, %s940_s17, %s940_s17, %s941_s23  }
  0x88 PF: > { %s540_s4 = sand.u32 1, %s915_s9   ;;  %p744_p2 = pnand %p627_p13, %p1013_p9 }
  0x89   : > { %s541_s16 = scalar_lea.sflag [#allocation4], %s540_s4 }
  0x8a   : > { %p745_p4 = pneg %p744_p2 }
  0x8c   : > { %910 = dma.done.wait (%p745_p4), %s541_s16, 128  }
  0x8d   : > { %912 = vsyncadd (%p745_p4), %s541_s16, 4294967168  ;;  %s19_s14 = sadd.s32 1, %s935_s14   ;;  %s1306_s9 = smov %s919_s10 }
  0x8e   : > { %p16_p6 = scmp.ge.s32.totalorder %s19_s14, 4   ;;  %s1307_s10 = smov %s923_s11 }
  0x8f   : > { %s1308_s11 = smov %s1051_s19  ;;  %s1309_s12 = smov %s931_s13 }
  0x90   : > { %s1310_s13 = smov %s1312_s28  ;;  %18 = sbr.rel (!%p16_p6) target bundleno = 7 (0x7), region = 88 }
  0x95   :  { %547 = vsyncpa [#allocation3], 1 }
  0x96   :  { %549 = vsyncpa [#allocation3 + $0x1], 1 }
  0x97   :  { %550 = vsyncpa [#allocation4], 1 }
  0x98   :  { %552 = vsyncpa [#allocation4 + $0x1], 1 }
  0x99   :  { %553 = vsyncpa [#allocation5], 1 }
  0x9a   :  { %555 = vsyncpa [#allocation5 + $0x1], 1 }

</bundles_post_ra>
